<compile_context>
chip_gen: v5e
topology: v5e:2x2
jax: 0.10.0
libtpu: 0.0.40
codegen_flags: <defaults>
</compile_context>

<pallas_src>
import jax
import jax.numpy as jnp
from jax import lax
from jax.experimental import pallas as pl
from jax.experimental.pallas import tpu as pltpu

HIDDEN = 32          # hidden_size for this synthetic instance
FF = 768             # intermediate width (fixed by the module)
OUT = 227            # number of classes (fixed by the module)
OUT_PAD = 256        # padded to a multiple of 128 lanes
LN_EPS = 1e-5
MAX_TB = 1024        # max batch-tile rows


def cls_head_kernel(x_ref, w1_ref, b1_ref, w2_ref, cs_ref, b2_ref, o_ref):
    # --- Linear(hidden -> 768) + bias + ReLU (tiny matmul, kept f32) ---
    h = jnp.dot(x_ref[...], w1_ref[...], preferred_element_type=jnp.float32)
    h = jnp.maximum(h + b1_ref[...], 0.0)                       # (TB, FF) f32

    # --- single-pass LayerNorm statistics (no centered/hn materialization) ---
    s = jnp.sum(h, axis=-1, keepdims=True)                      # (TB, 1)
    ss = jnp.sum(h * h, axis=-1, keepdims=True)                 # (TB, 1)
    mean = s * (1.0 / FF)
    var = ss * (1.0 / FF) - mean * mean
    inv_std = lax.rsqrt(var + LN_EPS)                           # EUP slot

    # --- Linear(768 -> 227 padded to 256), bf16 MXU with f32 accumulation ---
    # hn @ W2' = inv_std*(h @ W2') - (mean*inv_std)*colsum(W2')   (LN affine pre-folded)
    y = jnp.dot(h.astype(w2_ref.dtype), w2_ref[...],
                preferred_element_type=jnp.float32)             # (TB, OUT_PAD)
    out = inv_std * y - (mean * inv_std) * cs_ref[...] + b2_ref[...]
    o_ref[...] = out.astype(o_ref.dtype)


def prepare_params(w1, b1, gamma, beta, w2, b2):
    """One-time parameter preparation (fold LN affine, pad, cast, colsum).

    w1: (HIDDEN, FF), b1: (FF,)
    gamma, beta: (FF,)
    w2: (FF, OUT), b2: (OUT,)
    Returns (w1_f32, b1_2d, w2_bf16_padded, w2_colsum, b2_padded).
    """
    b1_2d = jnp.reshape(b1, (1, FF)).astype(jnp.float32)
    gamma_c = jnp.reshape(gamma, (FF, 1)).astype(jnp.float32)
    beta_r = jnp.reshape(beta, (1, FF)).astype(jnp.float32)
    b2_r = jnp.reshape(b2, (1, OUT)).astype(jnp.float32)
    w2_f32 = w2.astype(jnp.float32)

    # Fold LayerNorm affine into the final projection.
    w2_f = gamma_c * w2_f32                          # (FF, OUT)
    b2_f = beta_r @ w2_f32 + b2_r                    # (1, OUT)

    # Pad output lanes 227 -> 256 (zeros preserved by the kernel math).
    w2_p = jnp.zeros((FF, OUT_PAD), jnp.float32).at[:, :OUT].set(w2_f)
    b2_p = jnp.zeros((1, OUT_PAD), jnp.float32).at[:, :OUT].set(b2_f)

    # bf16 weights for the dominant MXU matmul; colsum taken from the *quantized*
    # weights (in f32) so the mean-subtraction term matches the matmul operand.
    w2_bf16 = w2_p.astype(jnp.bfloat16)
    w2_colsum = jnp.sum(w2_bf16.astype(jnp.float32), axis=0, keepdims=True)  # (1, OUT_PAD)

    return w1.astype(jnp.float32), b1_2d, w2_bf16, w2_colsum, b2_p


def _round_up(n, m):
    return ((n + m - 1) // m) * m


def _pick_tile(B):
    if B <= 8:
        return B  # single block == full batch extent (legal even when B % 8 != 0)
    # >= 2 grid steps (spans both v7x TensorCores), rows a multiple of 8, capped.
    return min(MAX_TB, _round_up((B + 1) // 2, 8))


def classification_head_padded(x, w1, b1_2d, w2_bf16, w2_colsum, b2_p):
    """x: (B, HIDDEN) f32. Returns (B, OUT_PAD) f32 (lanes OUT..255 are zero)."""
    B = x.shape[0]
    tb = _pick_tile(B)
    grid = (pl.cdiv(B, tb),)

    return pl.pallas_call(
        cls_head_kernel,
        out_shape=jax.ShapeDtypeStruct((B, OUT_PAD), jnp.float32),
        grid_spec=pltpu.PrefetchScalarGridSpec(
            num_scalar_prefetch=0,
            grid=grid,
            in_specs=[
                pl.BlockSpec((tb, HIDDEN), lambda i: (i, 0)),      # x        (tiled)
                pl.BlockSpec((HIDDEN, FF), lambda i: (0, 0)),      # W1       (resident, f32)
                pl.BlockSpec((1, FF), lambda i: (0, 0)),           # b1       (resident)
                pl.BlockSpec((FF, OUT_PAD), lambda i: (0, 0)),     # W2'      (resident, bf16)
                pl.BlockSpec((1, OUT_PAD), lambda i: (0, 0)),      # colsum   (resident)
                pl.BlockSpec((1, OUT_PAD), lambda i: (0, 0)),      # b2'      (resident)
            ],
            out_specs=pl.BlockSpec((tb, OUT_PAD), lambda i: (i, 0)),
        ),
        compiler_params=pltpu.CompilerParams(
            dimension_semantics=("parallel",),        # shard batch tiles across TCs (v7x)
            vmem_limit_bytes=32 * 1024 * 1024,        # headroom even on v7x (64 MiB phys)
        ),
    )(x, w1, b1_2d, w2_bf16, w2_colsum, b2_p)


def classification_head(x, w1, b1_2d, w2_bf16, w2_colsum, b2_p):
    """Convenience wrapper returning the unpadded (B, OUT) logits."""
    # Consumers that can keep the 256-lane slab should use classification_head_padded.
    return classification_head_padded(x, w1, b1_2d, w2_bf16, w2_colsum, b2_p)[:, :OUT]


def reference(x, w1, b1, gamma, beta, w2, b2):
    h = jnp.maximum(x @ w1 + jnp.reshape(b1, (1, FF)), 0.0)
    mean = jnp.mean(h, axis=-1, keepdims=True)
    var = jnp.mean((h - mean) ** 2, axis=-1, keepdims=True)
    hn = (h - mean) / jnp.sqrt(var + LN_EPS)
    hn = hn * jnp.reshape(gamma, (1, FF)) + jnp.reshape(beta, (1, FF))
    return hn @ w2 + jnp.reshape(b2, (1, OUT))


if __name__ == "__main__":
    key = jax.random.PRNGKey(0)
    kx, k1, kb1, kg, kbt, k2, kb2 = jax.random.split(key, 7)

    B = 2
    x = jax.random.normal(kx, (B, HIDDEN), dtype=jnp.float32)

    # Deterministic parameter init (PyTorch-Linear-like uniform bounds).
    bound1 = 1.0 / (HIDDEN ** 0.5)
    w1 = jax.random.uniform(k1, (HIDDEN, FF), jnp.float32, -bound1, bound1)
    b1 = jax.random.uniform(kb1, (FF,), jnp.float32, -bound1, bound1)
    # Non-trivial LayerNorm affine so the host-side fold is actually exercised.
    gamma = 1.0 + 0.1 * jax.random.normal(kg, (FF,), jnp.float32)
    beta = 0.1 * jax.random.normal(kbt, (FF,), jnp.float32)
    bound2 = 1.0 / (FF ** 0.5)
    w2 = jax.random.uniform(k2, (FF, OUT), jnp.float32, -bound2, bound2)
    b2 = jax.random.uniform(kb2, (OUT,), jnp.float32, -bound2, bound2)

    # One-time parameter preparation (fold + pad + bf16 cast + colsum) — off the per-call path.
    params = prepare_params(w1, b1, gamma, beta, w2, b2)
    params = jax.block_until_ready(params)
    w1_p, b1_p, w2_bf, cs_p, b2_p = params

    out = classification_head(x, w1_p, b1_p, w2_bf, cs_p, b2_p)
    out = jax.block_until_ready(out)

    ref = reference(x, w1, b1, gamma, beta, w2, b2)
    assert out.shape == (B, OUT), out.shape
    max_err = float(jnp.max(jnp.abs(out - ref)))
    # bf16 operands on the (768->227) projection -> tolerance loosened vs pure-f32.
    assert jnp.allclose(out, ref, atol=3e-2, rtol=3e-2), max_err

    # Padded lanes of the slab must stay zero (API contract for *_padded consumers).
    out_pad = classification_head_padded(x, w1_p, b1_p, w2_bf, cs_p, b2_p)
    out_pad = jax.block_until_ready(out_pad)
    assert float(jnp.max(jnp.abs(out_pad[:, OUT:]))) == 0.0

    print("KERNEL_OK")
</pallas_src>

<mosaic_0001>
module attributes {stable_mosaic.version = 11 : i64} {
  func.func @cls_head_kernel(%arg0: i32, %arg1: memref<2x32xf32, #tpu.memory_space<vmem>>, %arg2: memref<32x768xf32, #tpu.memory_space<vmem>>, %arg3: memref<1x768xf32, #tpu.memory_space<vmem>>, %arg4: memref<768x256xbf16, #tpu.memory_space<vmem>>, %arg5: memref<1x256xf32, #tpu.memory_space<vmem>>, %arg6: memref<1x256xf32, #tpu.memory_space<vmem>>, %arg7: memref<2x256xf32, #tpu.memory_space<vmem>>) attributes {dimension_semantics = [#tpu.dimension_semantics<parallel>], iteration_bounds = array<i64: 1>, scalar_prefetch = 0 : i64, scratch_operands = 0 : i64, tpu.core_type = #tpu.core_type<tc>, window_params = [{transform_indices = @transform_0, window_bounds = array<i64: 2, 32>}, {pipeline_mode = #tpu.pipeline_mode<synchronous>, transform_indices = @transform_1, window_bounds = array<i64: 32, 768>}, {pipeline_mode = #tpu.pipeline_mode<synchronous>, transform_indices = @transform_2, window_bounds = array<i64: 1, 768>}, {pipeline_mode = #tpu.pipeline_mode<synchronous>, transform_indices = @transform_3, window_bounds = array<i64: 768, 256>}, {pipeline_mode = #tpu.pipeline_mode<synchronous>, transform_indices = @transform_4, window_bounds = array<i64: 1, 256>}, {pipeline_mode = #tpu.pipeline_mode<synchronous>, transform_indices = @transform_5, window_bounds = array<i64: 1, 256>}, {transform_indices = @transform_6, window_bounds = array<i64: 2, 256>}]} {
    %c0 = arith.constant 0 : index
    %c0_0 = arith.constant 0 : index
    %0 = vector.load %arg1[%c0, %c0_0] : memref<2x32xf32, #tpu.memory_space<vmem>>, vector<2x32xf32>
    %c0_1 = arith.constant 0 : index
    %c0_2 = arith.constant 0 : index
    %1 = vector.load %arg2[%c0_1, %c0_2] : memref<32x768xf32, #tpu.memory_space<vmem>>, vector<32x768xf32>
    %cst = arith.constant dense<0.000000e+00> : vector<2x768xf32>
    %2 = tpu.matmul %0, %1, %cst {dimension_numbers = #tpu.dot_dimension_numbers<[1], [0], [0], [1], [0, 0, 1, 1], [], []>} : vector<2x32xf32>, vector<32x768xf32>, vector<2x768xf32> -> vector<2x768xf32>
    %c0_3 = arith.constant 0 : index
    %c0_4 = arith.constant 0 : index
    %3 = vector.load %arg3[%c0_3, %c0_4] : memref<1x768xf32, #tpu.memory_space<vmem>>, vector<1x768xf32>
    %4 = vector.broadcast %3 : vector<1x768xf32> to vector<2x768xf32>
    %5 = arith.addf %2, %4 : vector<2x768xf32>
    %cst_5 = arith.constant 0.000000e+00 : f32
    %6 = vector.broadcast %cst_5 : f32 to vector<2x768xf32>
    %7 = arith.maximumf %5, %6 : vector<2x768xf32>
    %cst_6 = arith.constant dense<0.000000e+00> : vector<2xf32>
    %8 = vector.multi_reduction <add>, %7, %cst_6 [1] : vector<2x768xf32> to vector<2xf32>
    %9 = vector.shape_cast %8 : vector<2xf32> to vector<2x1xf32>
    %10 = arith.mulf %7, %7 : vector<2x768xf32>
    %cst_7 = arith.constant dense<0.000000e+00> : vector<2xf32>
    %11 = vector.multi_reduction <add>, %10, %cst_7 [1] : vector<2x768xf32> to vector<2xf32>
    %12 = vector.shape_cast %11 : vector<2xf32> to vector<2x1xf32>
    %cst_8 = arith.constant 0.00130208337 : f32
    %13 = vector.broadcast %cst_8 : f32 to vector<2x1xf32>
    %14 = arith.mulf %9, %13 : vector<2x1xf32>
    %cst_9 = arith.constant 0.00130208337 : f32
    %15 = vector.broadcast %cst_9 : f32 to vector<2x1xf32>
    %16 = arith.mulf %12, %15 : vector<2x1xf32>
    %17 = arith.mulf %14, %14 : vector<2x1xf32>
    %18 = arith.subf %16, %17 : vector<2x1xf32>
    %cst_10 = arith.constant 9.99999974E-6 : f32
    %19 = vector.broadcast %cst_10 : f32 to vector<2x1xf32>
    %20 = arith.addf %18, %19 : vector<2x1xf32>
    %21 = math.rsqrt %20 : vector<2x1xf32>
    %22 = arith.truncf %7 : vector<2x768xf32> to vector<2x768xbf16>
    %c0_11 = arith.constant 0 : index
    %c0_12 = arith.constant 0 : index
    %23 = vector.load %arg4[%c0_11, %c0_12] : memref<768x256xbf16, #tpu.memory_space<vmem>>, vector<768x256xbf16>
    %cst_13 = arith.constant dense<0.000000e+00> : vector<2x256xf32>
    %24 = tpu.matmul %22, %23, %cst_13 {dimension_numbers = #tpu.dot_dimension_numbers<[1], [0], [0], [1], [0, 0, 1, 1], [], []>} : vector<2x768xbf16>, vector<768x256xbf16>, vector<2x256xf32> -> vector<2x256xf32>
    %25 = vector.broadcast %21 : vector<2x1xf32> to vector<2x256xf32>
    %26 = arith.mulf %25, %24 : vector<2x256xf32>
    %27 = arith.mulf %14, %21 : vector<2x1xf32>
    %c0_14 = arith.constant 0 : index
    %c0_15 = arith.constant 0 : index
    %28 = vector.load %arg5[%c0_14, %c0_15] : memref<1x256xf32, #tpu.memory_space<vmem>>, vector<1x256xf32>
    %29 = vector.broadcast %27 : vector<2x1xf32> to vector<2x256xf32>
    %30 = vector.broadcast %28 : vector<1x256xf32> to vector<2x256xf32>
    %31 = arith.mulf %29, %30 : vector<2x256xf32>
    %32 = arith.subf %26, %31 : vector<2x256xf32>
    %c0_16 = arith.constant 0 : index
    %c0_17 = arith.constant 0 : index
    %33 = vector.load %arg6[%c0_16, %c0_17] : memref<1x256xf32, #tpu.memory_space<vmem>>, vector<1x256xf32>
    %34 = vector.broadcast %33 : vector<1x256xf32> to vector<2x256xf32>
    %35 = arith.addf %32, %34 : vector<2x256xf32>
    %c0_18 = arith.constant 0 : index
    %c0_19 = arith.constant 0 : index
    %36 = vector.load %arg7[%c0_18, %c0_19] : memref<2x256xf32, #tpu.memory_space<vmem>>, vector<2x256xf32>
    tpu.vector_store %arg7[%c0_18, %c0_19], %35 {strides = array<i32>} : memref<2x256xf32, #tpu.memory_space<vmem>>, vector<2x256xf32>,
    return
  }
  func.func @transform_0(%arg0: i32) -> (i32, i32) {
    %c0_i32 = arith.constant 0 : i32
    %c0_i32_0 = arith.constant 0 : i32
    return %arg0, %c0_i32 : i32, i32
  }
  func.func @transform_1(%arg0: i32) -> (i32, i32) {
    %c0_i32 = arith.constant 0 : i32
    %c0_i32_0 = arith.constant 0 : i32
    %c0_i32_1 = arith.constant 0 : i32
    return %c0_i32, %c0_i32_0 : i32, i32
  }
  func.func @transform_2(%arg0: i32) -> (i32, i32) {
    %c0_i32 = arith.constant 0 : i32
    %c0_i32_0 = arith.constant 0 : i32
    %c0_i32_1 = arith.constant 0 : i32
    return %c0_i32, %c0_i32_0 : i32, i32
  }
  func.func @transform_3(%arg0: i32) -> (i32, i32) {
    %c0_i32 = arith.constant 0 : i32
    %c0_i32_0 = arith.constant 0 : i32
    %c0_i32_1 = arith.constant 0 : i32
    return %c0_i32, %c0_i32_0 : i32, i32
  }
  func.func @transform_4(%arg0: i32) -> (i32, i32) {
    %c0_i32 = arith.constant 0 : i32
    %c0_i32_0 = arith.constant 0 : i32
    %c0_i32_1 = arith.constant 0 : i32
    return %c0_i32, %c0_i32_0 : i32, i32
  }
  func.func @transform_5(%arg0: i32) -> (i32, i32) {
    %c0_i32 = arith.constant 0 : i32
    %c0_i32_0 = arith.constant 0 : i32
    %c0_i32_1 = arith.constant 0 : i32
    return %c0_i32, %c0_i32_0 : i32, i32
  }
  func.func @transform_6(%arg0: i32) -> (i32, i32) {
    %c0_i32 = arith.constant 0 : i32
    %c0_i32_0 = arith.constant 0 : i32
    return %arg0, %c0_i32 : i32, i32
  }
}

</mosaic_0001>

<bundles_post_ra>
// kernel: tpu_custom_call.1
= control target key start
LH: loop header
LB: loop body
LE: loop exit
PB: predicated region body
PF: predicated region fallthrough
CT: control target
= control target key end

     0   :  { %11 = vsyncpa [#allocation3], 0  ;;  %s1831_s0 = inlined_call_operand.hbm [shape: f32[2,32], index: 0, kind: input, shape index: {}]   ;;  %s1832_s1 = inlined_call_operand.hbm [shape: f32[32,768], index: 1, kind: input, shape index: {}]   ;;  %s1833_s2 = inlined_call_operand.hbm [shape: f32[1,768], index: 2, kind: input, shape index: {}]   ;;  %s1834_s3 = inlined_call_operand.hbm [shape: bf16[768,256], index: 3, kind: input, shape index: {}]   ;;  %s1835_s4 = inlined_call_operand.vmem [shape: f32[1,256], index: 4, kind: input, shape index: {}]   ;;  %s1836_s5 = inlined_call_operand.vmem [shape: f32[1,256], index: 5, kind: input, shape index: {}]   ;;  %s1837_s6 = inlined_call_operand.hbm [shape: f32[2,256], index: 6, kind: output, shape index: {}]  }
   0x1   :  { %12 = vsyncpa [#allocation6], 0 }
   0x2   :  { %13 = vsyncpa [#allocation9], 0  ;;  %s30_s23 = sshll.u32 %s1832_s1, 4  ;;  %s31_s23 = int_to_ptr.hbm [resolvable:$true] %s30_s23 }
   0x3   :  { %14 = vsyncpa [#allocation4], 0  ;;  %s1709_s24 = smov [#allocation5]   ;;  %s20_s28 = sshll.u32 %s1831_s0, 4  ;;  %s21_s28 = int_to_ptr.hbm [resolvable:$true] %s20_s28 }
   0x4   :  { %s32_s25 = sshll.u32 %s1709_s24, 4  ;;  %s1710_s29 = smov 768   ;;  %s33_s25 = int_to_ptr.vmem [resolvable:$true] %s32_s25 }
   0x5   :  { %s1711_s30 = smov 48   ;;  %s1712_s7 = smov [#allocation2]  }
   0x6   :  { %38 = dma.hbm_to_vmem [thread:$0]  %s31_s23, 3072, %s33_s25, [#allocation6], %s1710_s29, %s1710_s29, %s1711_s30  }
   0x7   :  { %s22_s8 = sshll.u32 %s1712_s7, 4  ;;  %s44_s11 = sshll.u32 %s1833_s2, 4  ;;  %s23_s8 = int_to_ptr.vmem [resolvable:$true] %s22_s8  ;;  %s45_s11 = int_to_ptr.hbm [resolvable:$true] %s44_s11 }
   0x8   :  { %25 = dma.hbm_to_vmem [thread:$0]  %s21_s28, 32, %s23_s8, [#allocation3]  }
   0x9   :  { %s54_s13 = sshll.u32 %s1834_s3, 4  ;;  %s1713_s14 = smov [#allocation7]   ;;  %s55_s13 = int_to_ptr.hbm [resolvable:$true] %s54_s13 }
   0xa   :  { %s46_s15 = sshll.u32 %s1713_s14, 4  ;;  %s1714_s0 = smov [#allocation8]   ;;  %s47_s15 = int_to_ptr.vmem [resolvable:$true] %s46_s15 }
   0xb   :  { %49 = dma.hbm_to_vmem [thread:$0]  %s45_s11, 96, %s47_s15, [#allocation6]  }
   0xc   :  { %s56_s16 = sshll.u32 %s1714_s0, 4  ;;  %s1715_s17 = smov 128   ;;  %s57_s16 = int_to_ptr.vmem [resolvable:$true] %s56_s16 }
   0xd   :  { %s1716_s18 = smov 8  }
   0xe   :  { %62 = dma.hbm_to_vmem [thread:$0]  %s55_s13, 12288, %s57_s16, [#allocation9], %s1715_s17, %s1715_s17, %s1716_s18  }
   0xf   :  { %1701 = dma.done.wait [#allocation3], 32  }
  0x10   :  { %1702 = vsyncadd [#allocation3], 4294967264 }
  0x11   :  { %1703 = dma.done.wait [#allocation6], 3168  }
  0x12   :  { %1704 = vsyncadd [#allocation6], 4294964128 }
  0x13   :  { %1705 = dma.done.wait [#allocation9], 12288  }
  0x14   :  { %1706 = vsyncadd [#allocation9], 4294955008  ;;  %v102_v0 = vld [vmem:[#allocation5 + $0x90] sm:$0xff]  ;;  %v103_v1 = vld [vmem:[#allocation5 + $0x98] sm:$0xff]  ;;  %vm122_vm0 = vcmask 261120   ;;  %vm252_vm1 = vcmask 1041408  }
  0x15   :  { %v104_v2 = vld [vmem:[#allocation5 + $0xa0] sm:$0xff]  ;;  %138 = vmatpush.msra.mxu0 %v102_v0  ;;  %158 = vmatpush.msra.mxu1 %v103_v1  ;;  %v105_v3 = vld [vmem:[#allocation5 + $0xa8] sm:$0xff]  ;;  %v98_v6 = vld [vmem:[#allocation5 + $0x70] sm:$0xff]  ;;  %s1072_s24 = sshll.u32 %s1837_s6, 4  ;;  %s1073_s24 = int_to_ptr.hbm [resolvable:$true] %s1072_s24 }
  0x16   :  { %v96_v4 = vld [vmem:[#allocation5 + $0x60] sm:$0xff]  ;;  %v97_v5 = vld [vmem:[#allocation5 + $0x68] sm:$0xff]  ;;  %178 = vmatpush.msra.mxu2 %v104_v2  ;;  %198 = vmatpush.msra.mxu3 %v105_v3  ;;  %v99_v7 = vld [vmem:[#allocation5 + $0x78] sm:$0xff] }
  0x17   :  { %v90_v8 = vld [vmem:[#allocation5 + $0x30] sm:$0xff]  ;;  %139 = vmatpush.msra.mxu0 %v96_v4  ;;  %159 = vmatpush.msra.mxu1 %v97_v5  ;;  %v91_v9 = vld [vmem:[#allocation5 + $0x38] sm:$0xff]  ;;  %v92_v10 = vld [vmem:[#allocation5 + $0x40] sm:$0xff] }
  0x18   :  { %v93_v11 = vld [vmem:[#allocation5 + $0x48] sm:$0xff]  ;;  %179 = vmatpush.msra.mxu2 %v98_v6  ;;  %199 = vmatpush.msra.mxu3 %v99_v7  ;;  %v84_v12 = vld [vmem:[#allocation5] sm:$0xff]  ;;  %v86_v14 = vld [vmem:[#allocation5 + $0x10] sm:$0xff] }
  0x19   :  { %v85_v13 = vld [vmem:[#allocation5 + $0x8] sm:$0xff]  ;;  %140 = vmatpush.msra.mxu0 %v90_v8  ;;  %160 = vmatpush.msra.mxu1 %v91_v9  ;;  %v87_v15 = vld [vmem:[#allocation5 + $0x18] sm:$0xff]  ;;  %v106_v17 = vld [vmem:[#allocation5 + $0xb0] sm:$0xff] }
  0x1a   :  { %180 = vmatpush.msra.mxu2 %v92_v10  ;;  %200 = vmatpush.msra.mxu3 %v93_v11  ;;  %v1765_v16 = vld [vmem:[#allocation2] sm:$0x3]  ;;  %v100_v19 = vld [vmem:[#allocation5 + $0x80] sm:$0xff]  ;;  %v101_v20 = vld [vmem:[#allocation5 + $0x88] sm:$0xff] }
  0x1b   :  { %141 = vmatpush.msra.mxu0 %v84_v12  ;;  %161 = vmatpush.msra.mxu1 %v85_v13  ;;  %v107_v18 = vld [vmem:[#allocation5 + $0xb8] sm:$0xff]  ;;  %v1140_v26 = vld [vmem:[#allocation8 + $0x60] sm:$0xf]  ;;  %v94_v27 = vld [vmem:[#allocation5 + $0x50] sm:$0xff] }
  0x1c   :  { %181 = vmatpush.msra.mxu2 %v86_v14  ;;  %201 = vmatpush.msra.mxu3 %v87_v15  ;;  %v1148_v21 = vld [vmem:[#allocation8 + $0x70] sm:$0xf]  ;;  %v1489_v22 = vld [vmem:[#allocation8 + $0x74] sm:$0xf0]  ;;  %v1487_v29 = vld [vmem:[#allocation8 + $0x64] sm:$0xf0] }
  0x1d   :  { %1084 = vmatmul.msk.f32.vlgmr.msra.gmra.mxu0 %vm122_vm0, %v1765_v16  ;;  %1085 = vmatmul.msk.f32.vlgmr.msra.gmra.mxu1 %vm122_vm0, %v1765_v16  ;;  %v1149_v23 = vor.u32 %v1489_v22, %v1148_v21  ;;  %v1212_v24 = vld [vmem:[#allocation8 + $0xf0] sm:$0xf]  ;;  %v1505_v25 = vld [vmem:[#allocation8 + $0xf4] sm:$0xf0]  ;;  %v1204_v30 = vld [vmem:[#allocation8 + $0xe0] sm:$0xf]  ;;  %v1141_v35 = vor.u32 %v1487_v29, %v1140_v26 }
  0x1e   :  { %1086 = vmatmul.msk.f32.vlgmr.msra.gmra.mxu2 %vm122_vm0, %v1765_v16  ;;  %1087 = vmatmul.msk.f32.vlgmr.msra.gmra.mxu3 %vm122_vm0, %v1765_v16  ;;  %v1213_v28 = vor.u32 %v1505_v25, %v1212_v24  ;;  %v1503_v31 = vld [vmem:[#allocation8 + $0xe4] sm:$0xf0]  ;;  %v95_v32 = vld [vmem:[#allocation5 + $0x58] sm:$0xff]  ;;  %v88_v43 = vld [vmem:[#allocation5 + $0x20] sm:$0xff] }
  0x1f   :  { %218 = vmatpush.msrb.mxu0 %v106_v17  ;;  %238 = vmatpush.msrb.mxu1 %v107_v18  ;;  %v1276_v33 = vld [vmem:[#allocation8 + $0x170] sm:$0xf]  ;;  %v1521_v34 = vld [vmem:[#allocation8 + $0x174] sm:$0xf0]  ;;  %v1205_v36 = vor.u32 %v1503_v31, %v1204_v30  ;;  %v89_v44 = vld [vmem:[#allocation5 + $0x28] sm:$0xff] }
  0x20   :  { %882 = vmatpush.bf16.msrb.mxu2 %v1149_v23  ;;  %895 = vmatpush.bf16.msrb.mxu3 %v1213_v28  ;;  %v1340_v37 = vld [vmem:[#allocation8 + $0x1f0] sm:$0xf]  ;;  %v1537_v38 = vld [vmem:[#allocation8 + $0x1f4] sm:$0xf0]  ;;  %v1277_v45 = vor.u32 %v1521_v34, %v1276_v33  ;;  %v1268_v47 = vld [vmem:[#allocation8 + $0x160] sm:$0xf] }
  0x21   :  { %v1132_v39 = vld [vmem:[#allocation8 + $0x50] sm:$0xf]  ;;  %219 = vmatpush.msrb.mxu0 %v100_v19  ;;  %239 = vmatpush.msrb.mxu1 %v101_v20  ;;  %v1485_v40 = vld [vmem:[#allocation8 + $0x54] sm:$0xf0]  ;;  %v1341_v46 = vor.u32 %v1537_v38, %v1340_v37  ;;  %v1519_v48 = vld [vmem:[#allocation8 + $0x164] sm:$0xf0] }
  0x22   :  { %v1196_v41 = vld [vmem:[#allocation8 + $0xd0] sm:$0xf]  ;;  %v1501_v42 = vld [vmem:[#allocation8 + $0xd4] sm:$0xf0]  ;;  %v1133_v49 = vor.u32 %v1485_v40, %v1132_v39  ;;  %v1332_v51 = vld [vmem:[#allocation8 + $0x1e0] sm:$0xf]  ;;  %v1269_v57 = vor.u32 %v1519_v48, %v1268_v47 }
  0x23   :  { %220 = vmatpush.msrb.mxu0 %v94_v27  ;;  %240 = vmatpush.msrb.mxu1 %v95_v32  ;;  %v1197_v50 = vor.u32 %v1501_v42, %v1196_v41  ;;  %v1535_v52 = vld [vmem:[#allocation8 + $0x1e4] sm:$0xf0]  ;;  %v1124_v53 = vld [vmem:[#allocation8 + $0x40] sm:$0xf]  ;;  %v1260_v59 = vld [vmem:[#allocation8 + $0x150] sm:$0xf] }
  0x24   :  { %883 = vmatpush.bf16.msrb.mxu2 %v1141_v35  ;;  %896 = vmatpush.bf16.msrb.mxu3 %v1205_v36  ;;  %v1483_v54 = vld [vmem:[#allocation8 + $0x44] sm:$0xf0]  ;;  %v1188_v55 = vld [vmem:[#allocation8 + $0xc0] sm:$0xf]  ;;  %v1333_v58 = vor.u32 %v1535_v52, %v1332_v51  ;;  %v1517_v60 = vld [vmem:[#allocation8 + $0x154] sm:$0xf0] }
  0x25   :  { %221 = vmatpush.msrb.mxu0 %v88_v43  ;;  %241 = vmatpush.msrb.mxu1 %v89_v44  ;;  %v1499_v56 = vld [vmem:[#allocation8 + $0xc4] sm:$0xf0]  ;;  %v1125_v61 = vor.u32 %v1483_v54, %v1124_v53  ;;  %v1324_v63 = vld [vmem:[#allocation8 + $0x1d0] sm:$0xf]  ;;  %v1533_v0 = vld [vmem:[#allocation8 + $0x1d4] sm:$0xf0]  ;;  %v1261_v5 = vor.u32 %v1517_v60, %v1260_v59 }
  0x26   :  { %1088 = vmatmul.msk.f32.vlgmr.msrb.gmra.mxu0 %vm122_vm0, %v1765_v16  ;;  %1089 = vmatmul.msk.f32.vlgmr.msrb.gmra.mxu1 %vm122_vm0, %v1765_v16  ;;  %v1189_v62 = vor.u32 %v1499_v56, %v1188_v55  ;;  %v1116_v1 = vld [vmem:[#allocation8 + $0x30] sm:$0xf]  ;;  %v1481_v2 = vld [vmem:[#allocation8 + $0x34] sm:$0xf0]  ;;  %v1325_v6 = vor.u32 %v1533_v0, %v1324_v63  ;;  %v1252_v7 = vld [vmem:[#allocation8 + $0x140] sm:$0xf] }
  0x27   :  { %908 = vmatpush.bf16.msra.mxu0 %v1277_v45  ;;  %921 = vmatpush.bf16.msra.mxu1 %v1341_v46  ;;  %v1180_v3 = vld [vmem:[#allocation8 + $0xb0] sm:$0xf]  ;;  %v1497_v4 = vld [vmem:[#allocation8 + $0xb4] sm:$0xf0]  ;;  %v1515_v8 = vld [vmem:[#allocation8 + $0x144] sm:$0xf0]  ;;  %v1117_v9 = vor.u32 %v1481_v2, %v1116_v1 }
  0x28   :  { %884 = vmatpush.bf16.msrb.mxu2 %v1133_v49  ;;  %897 = vmatpush.bf16.msrb.mxu3 %v1197_v50  ;;  %v1181_v10 = vor.u32 %v1497_v4, %v1180_v3  ;;  %v1316_v11 = vld [vmem:[#allocation8 + $0x1c0] sm:$0xf]  ;;  %v1531_v12 = vld [vmem:[#allocation8 + $0x1c4] sm:$0xf0]  ;;  %v1253_v17 = vor.u32 %v1515_v8, %v1252_v7  ;;  %v1244_v19 = vld [vmem:[#allocation8 + $0x130] sm:$0xf] }
  0x29   :  { %v1108_v13 = vld [vmem:[#allocation8 + $0x20] sm:$0xf]  ;;  %v1479_v14 = vld [vmem:[#allocation8 + $0x24] sm:$0xf0]  ;;  %v1317_v18 = vor.u32 %v1531_v12, %v1316_v11  ;;  %v1513_v20 = vld [vmem:[#allocation8 + $0x134] sm:$0xf0] }
  0x2a   :  { %v1172_v15 = vld [vmem:[#allocation8 + $0xa0] sm:$0xf]  ;;  %v1495_v16 = vld [vmem:[#allocation8 + $0xa4] sm:$0xf0]  ;;  %v1109_v21 = vor.u32 %v1479_v14, %v1108_v13  ;;  %v1308_v23 = vld [vmem:[#allocation8 + $0x1b0] sm:$0xf]  ;;  %v1245_v29 = vor.u32 %v1513_v20, %v1244_v19 }
  0x2b   :  { %909 = vmatpush.bf16.msra.mxu0 %v1269_v57  ;;  %922 = vmatpush.bf16.msra.mxu1 %v1333_v58  ;;  %v1173_v22 = vor.u32 %v1495_v16, %v1172_v15  ;;  %v1529_v24 = vld [vmem:[#allocation8 + $0x1b4] sm:$0xf0]  ;;  %v1100_v25 = vld [vmem:[#allocation8 + $0x10] sm:$0xf]  ;;  %v1236_v31 = vld [vmem:[#allocation8 + $0x120] sm:$0xf] }
  0x2c   :  { %885 = vmatpush.bf16.msrb.mxu2 %v1125_v61  ;;  %898 = vmatpush.bf16.msrb.mxu3 %v1189_v62  ;;  %v1477_v26 = vld [vmem:[#allocation8 + $0x14] sm:$0xf0]  ;;  %v1164_v27 = vld [vmem:[#allocation8 + $0x90] sm:$0xf]  ;;  %v1309_v30 = vor.u32 %v1529_v24, %v1308_v23  ;;  %v1511_v32 = vld [vmem:[#allocation8 + $0x124] sm:$0xf0] }
  0x2d   :  { %v1493_v28 = vld [vmem:[#allocation8 + $0x94] sm:$0xf0]  ;;  %v1300_v33 = vld [vmem:[#allocation8 + $0x1a0] sm:$0xf]  ;;  %v1101_v34 = vor.u32 %v1477_v26, %v1100_v25  ;;  %v1527_v36 = vld [vmem:[#allocation8 + $0x1a4] sm:$0xf0]  ;;  %v1237_v45 = vor.u32 %v1511_v32, %v1236_v31 }
  0x2e   :  { %v1165_v35 = vor.u32 %v1493_v28, %v1164_v27  ;;  %v1092_v37 = vld [vmem:[#allocation8] sm:$0xf]  ;;  %v1475_v38 = vld [vmem:[#allocation8 + $0x4] sm:$0xf0]  ;;  %v1404_v41 = vld [vmem:[#allocation8 + $0x270] sm:$0xf]  ;;  %v1301_v46 = vor.u32 %v1527_v36, %v1300_v33 }
  0x2f   :  { %910 = vmatpush.bf16.msra.mxu0 %v1261_v5  ;;  %923 = vmatpush.bf16.msra.mxu1 %v1325_v6  ;;  %v1156_v39 = vld [vmem:[#allocation8 + $0x80] sm:$0xf]  ;;  %v1491_v40 = vld [vmem:[#allocation8 + $0x84] sm:$0xf0]  ;;  %v1553_v42 = vld [vmem:[#allocation8 + $0x274] sm:$0xf0]  ;;  %v1093_v48 = vor.u32 %v1475_v38, %v1092_v37 }
  0x30   :  { %886 = vmatpush.bf16.msrb.mxu2 %v1117_v9  ;;  %899 = vmatpush.bf16.msrb.mxu3 %v1181_v10  ;;  %v1468_v43 = vld [vmem:[#allocation8 + $0x2f0] sm:$0xf]  ;;  %v1569_v44 = vld [vmem:[#allocation8 + $0x2f4] sm:$0xf0]  ;;  %v1157_v49 = vor.u32 %v1491_v40, %v1156_v39  ;;  %v1405_v53 = vor.u32 %v1553_v42, %v1404_v41  ;;  %v1396_v55 = vld [vmem:[#allocation8 + $0x260] sm:$0xf] }
  0x31   :  { %v1228_v47 = vld [vmem:[#allocation8 + $0x110] sm:$0xf]  ;;  %v1509_v50 = vld [vmem:[#allocation8 + $0x114] sm:$0xf0]  ;;  %v1469_v54 = vor.u32 %v1569_v44, %v1468_v43  ;;  %v1551_v56 = vld [vmem:[#allocation8 + $0x264] sm:$0xf0] }
  0x32   :  { %v1292_v51 = vld [vmem:[#allocation8 + $0x190] sm:$0xf]  ;;  %v1525_v52 = vld [vmem:[#allocation8 + $0x194] sm:$0xf0]  ;;  %v1460_v57 = vld [vmem:[#allocation8 + $0x2e0] sm:$0xf]  ;;  %v1229_v59 = vor.u32 %v1509_v50, %v1228_v47  ;;  %v1397_v3 = vor.u32 %v1551_v56, %v1396_v55 }
  0x33   :  { %911 = vmatpush.bf16.msra.mxu0 %v1253_v17  ;;  %924 = vmatpush.bf16.msra.mxu1 %v1317_v18  ;;  %v1567_v58 = vld [vmem:[#allocation8 + $0x2e4] sm:$0xf0]  ;;  %v1293_v60 = vor.u32 %v1525_v52, %v1292_v51  ;;  %v1220_v61 = vld [vmem:[#allocation8 + $0x100] sm:$0xf]  ;;  %v1488_v1 = vld [vmem:[#allocation8 + $0x74] sm:$0xf] }
  0x34   :  { %887 = vmatpush.bf16.msrb.mxu2 %v1109_v21  ;;  %900 = vmatpush.bf16.msrb.mxu3 %v1173_v22  ;;  %v1507_v62 = vld [vmem:[#allocation8 + $0x104] sm:$0xf0]  ;;  %v1284_v63 = vld [vmem:[#allocation8 + $0x180] sm:$0xf]  ;;  %v1150_v2 = vld [vmem:[#allocation8 + $0x78] sm:$0xf0]  ;;  %v1461_v4 = vor.u32 %v1567_v58, %v1460_v57 }
  0x35   :  { %v1523_v0 = vld [vmem:[#allocation8 + $0x184] sm:$0xf0]  ;;  %v1504_v5 = vld [vmem:[#allocation8 + $0xf4] sm:$0xf]  ;;  %v1214_v6 = vld [vmem:[#allocation8 + $0xf8] sm:$0xf0]  ;;  %v1221_v11 = vor.u32 %v1507_v62, %v1220_v61  ;;  %v1153_v13 = vor.u32 %v1488_v1, %v1150_v2 }
  0x36   :  { %v1388_v7 = vld [vmem:[#allocation8 + $0x250] sm:$0xf]  ;;  %v1549_v8 = vld [vmem:[#allocation8 + $0x254] sm:$0xf0]  ;;  %v1285_v12 = vor.u32 %v1523_v0, %v1284_v63  ;;  %v1217_v14 = vor.u32 %v1504_v5, %v1214_v6  ;;  %v1486_v15 = vld [vmem:[#allocation8 + $0x64] sm:$0xf] }
  0x37   :  { %912 = vmatpush.bf16.msra.mxu0 %v1245_v29  ;;  %925 = vmatpush.bf16.msra.mxu1 %v1309_v30  ;;  %v1452_v9 = vld [vmem:[#allocation8 + $0x2d0] sm:$0xf]  ;;  %v1565_v10 = vld [vmem:[#allocation8 + $0x2d4] sm:$0xf0]  ;;  %v1142_v16 = vld [vmem:[#allocation8 + $0x68] sm:$0xf0]  ;;  %v1389_v17 = vor.u32 %v1549_v8, %v1388_v7 }
  0x38   :  { %888 = vmatpush.bf16.msrb.mxu2 %v1101_v34  ;;  %901 = vmatpush.bf16.msrb.mxu3 %v1165_v35  ;;  %v1453_v18 = vor.u32 %v1565_v10, %v1452_v9  ;;  %v1502_v19 = vld [vmem:[#allocation8 + $0xe4] sm:$0xf]  ;;  %v1206_v20 = vld [vmem:[#allocation8 + $0xe8] sm:$0xf0]  ;;  %v1380_v21 = vld [vmem:[#allocation8 + $0x240] sm:$0xf]  ;;  %v1145_v25 = vor.u32 %v1486_v15, %v1142_v16 }
  0x39   :  { %v1547_v22 = vld [vmem:[#allocation8 + $0x244] sm:$0xf0]  ;;  %v1444_v23 = vld [vmem:[#allocation8 + $0x2c0] sm:$0xf]  ;;  %v1209_v26 = vor.u32 %v1502_v19, %v1206_v20  ;;  %v1484_v27 = vld [vmem:[#allocation8 + $0x54] sm:$0xf] }
  0x3a   :  { %v1563_v24 = vld [vmem:[#allocation8 + $0x2c4] sm:$0xf0]  ;;  %v1134_v28 = vld [vmem:[#allocation8 + $0x58] sm:$0xf0]  ;;  %v1381_v29 = vor.u32 %v1547_v22, %v1380_v21  ;;  %v1500_v31 = vld [vmem:[#allocation8 + $0xd4] sm:$0xf] }
  0x3b   :  { %913 = vmatpush.bf16.msra.mxu0 %v1237_v45  ;;  %926 = vmatpush.bf16.msra.mxu1 %v1301_v46  ;;  %v1445_v30 = vor.u32 %v1563_v24, %v1444_v23  ;;  %v1198_v32 = vld [vmem:[#allocation8 + $0xd8] sm:$0xf0]  ;;  %v1372_v33 = vld [vmem:[#allocation8 + $0x230] sm:$0xf]  ;;  %v1545_v34 = vld [vmem:[#allocation8 + $0x234] sm:$0xf0]  ;;  %v1137_v37 = vor.u32 %v1484_v27, %v1134_v28 }
  0x3c   :  { %889 = vmatpush.bf16.msrb.mxu2 %v1093_v48  ;;  %902 = vmatpush.bf16.msrb.mxu3 %v1157_v49  ;;  %v1436_v35 = vld [vmem:[#allocation8 + $0x2b0] sm:$0xf]  ;;  %v1561_v36 = vld [vmem:[#allocation8 + $0x2b4] sm:$0xf0]  ;;  %v1201_v38 = vor.u32 %v1500_v31, %v1198_v32  ;;  %v1482_v39 = vld [vmem:[#allocation8 + $0x44] sm:$0xf]  ;;  %v1373_v41 = vor.u32 %v1545_v34, %v1372_v33 }
  0x3d   :  { %v1126_v40 = vld [vmem:[#allocation8 + $0x48] sm:$0xf0]  ;;  %v1437_v42 = vor.u32 %v1561_v36, %v1436_v35  ;;  %v1498_v43 = vld [vmem:[#allocation8 + $0xc4] sm:$0xf]  ;;  %v1364_v45 = vld [vmem:[#allocation8 + $0x220] sm:$0xf] }
  0x3e   :  { %v1190_v44 = vld [vmem:[#allocation8 + $0xc8] sm:$0xf0]  ;;  %v1543_v46 = vld [vmem:[#allocation8 + $0x224] sm:$0xf0]  ;;  %v1428_v47 = vld [vmem:[#allocation8 + $0x2a0] sm:$0xf]  ;;  %v1129_v49 = vor.u32 %v1482_v39, %v1126_v40 }
  0x3f   :  { %914 = vmatpush.bf16.msra.mxu0 %v1229_v59  ;;  %927 = vmatpush.bf16.msra.mxu1 %v1293_v60  ;;  %v1559_v48 = vld [vmem:[#allocation8 + $0x2a4] sm:$0xf0]  ;;  %v1193_v50 = vor.u32 %v1498_v43, %v1190_v44  ;;  %v1365_v51 = vor.u32 %v1543_v46, %v1364_v45  ;;  %v1496_v55 = vld [vmem:[#allocation8 + $0xb4] sm:$0xf]  ;;  %v1182_v57 = vld [vmem:[#allocation8 + $0xb8] sm:$0xf0] }
  0x40   :  { %934 = vmatpush.bf16.msra.mxu2 %v1405_v53  ;;  %947 = vmatpush.bf16.msra.mxu3 %v1469_v54  ;;  %v1429_v52 = vor.u32 %v1559_v48, %v1428_v47  ;;  %v1480_v53 = vld [vmem:[#allocation8 + $0x34] sm:$0xf]  ;;  %v1118_v54 = vld [vmem:[#allocation8 + $0x38] sm:$0xf0]  ;;  %v1185_v58 = vor.u32 %v1496_v55, %v1182_v57  ;;  %v1356_v59 = vld [vmem:[#allocation8 + $0x210] sm:$0xf] }
  0x41   :  { %v1121_v56 = vor.u32 %v1480_v53, %v1118_v54  ;;  %v1541_v60 = vld [vmem:[#allocation8 + $0x214] sm:$0xf0]  ;;  %v1420_v61 = vld [vmem:[#allocation8 + $0x290] sm:$0xf]  ;;  %v1478_v1 = vld [vmem:[#allocation8 + $0x24] sm:$0xf] }
  0x42   :  { %v1357_v62 = vor.u32 %v1541_v60, %v1356_v59  ;;  %v1557_v63 = vld [vmem:[#allocation8 + $0x294] sm:$0xf0]  ;;  %v1110_v2 = vld [vmem:[#allocation8 + $0x28] sm:$0xf0]  ;;  %v1348_v7 = vld [vmem:[#allocation8 + $0x200] sm:$0xf] }
  0x43   :  { %915 = vmatpush.bf16.msra.mxu0 %v1221_v11  ;;  %928 = vmatpush.bf16.msra.mxu1 %v1285_v12  ;;  %v1421_v0 = vor.u32 %v1557_v63, %v1420_v61  ;;  %v1174_v5 = vld [vmem:[#allocation8 + $0xa8] sm:$0xf0]  ;;  %v1539_v8 = vld [vmem:[#allocation8 + $0x204] sm:$0xf0]  ;;  %v1412_v10 = vld [vmem:[#allocation8 + $0x280] sm:$0xf] }
  0x44   :  { %935 = vmatpush.bf16.msra.mxu2 %v1397_v3  ;;  %948 = vmatpush.bf16.msra.mxu3 %v1461_v4  ;;  %v1113_v3 = vor.u32 %v1478_v1, %v1110_v2  ;;  %v1494_v4 = vld [vmem:[#allocation8 + $0xa4] sm:$0xf]  ;;  %v1349_v9 = vor.u32 %v1539_v8, %v1348_v7  ;;  %v1555_v11 = vld [vmem:[#allocation8 + $0x284] sm:$0xf0]  ;;  %v1492_v15 = vld [vmem:[#allocation8 + $0x94] sm:$0xf] }
  0x45   :  { %v1177_v6 = vor.u32 %v1494_v4, %v1174_v5  ;;  %v1413_v12 = vor.u32 %v1555_v11, %v1412_v10  ;;  %v1474_v19 = vld [vmem:[#allocation8 + $0x4] sm:$0xf]  ;;  %v1094_v20 = vld [vmem:[#allocation8 + $0x8] sm:$0xf0]  ;;  %v1520_v34 = vld [vmem:[#allocation8 + $0x174] sm:$0xf] }
  0x46   :  { %v1490_v21 = vld [vmem:[#allocation8 + $0x84] sm:$0xf]  ;;  %v1097_v22 = vor.u32 %v1474_v19, %v1094_v20  ;;  %v1158_v23 = vld [vmem:[#allocation8 + $0x88] sm:$0xf0]  ;;  %v1278_v35 = vld [vmem:[#allocation8 + $0x178] sm:$0xf0] }
  0x47   :  { %960 = vmatpush.bf16.msrb.mxu0 %v1153_v13  ;;  %973 = vmatpush.bf16.msrb.mxu1 %v1217_v14  ;;  %v1476_v13 = vld [vmem:[#allocation8 + $0x14] sm:$0xf]  ;;  %v1102_v14 = vld [vmem:[#allocation8 + $0x18] sm:$0xf0]  ;;  %v1161_v24 = vor.u32 %v1490_v21, %v1158_v23  ;;  %v1518_v40 = vld [vmem:[#allocation8 + $0x164] sm:$0xf]  ;;  %v1281_v46 = vor.u32 %v1520_v34, %v1278_v35 }
  0x48   :  { %936 = vmatpush.bf16.msra.mxu2 %v1389_v17  ;;  %949 = vmatpush.bf16.msra.mxu3 %v1453_v18  ;;  %v1105_v16 = vor.u32 %v1476_v13, %v1102_v14  ;;  %v1166_v17 = vld [vmem:[#allocation8 + $0x98] sm:$0xf0]  ;;  %v1536_v36 = vld [vmem:[#allocation8 + $0x1f4] sm:$0xf]  ;;  %v1534_v44 = vld [vmem:[#allocation8 + $0x1e4] sm:$0xf] }
  0x49   :  { %v1169_v18 = vor.u32 %v1492_v15, %v1166_v17  ;;  %v1334_v45 = vld [vmem:[#allocation8 + $0x1e8] sm:$0xf0]  ;;  %v1552_v48 = vld [vmem:[#allocation8 + $0x274] sm:$0xf]  ;;  %v1470_v53 = vld [vmem:[#allocation8 + $0x2f8] sm:$0xf0] }
  0x4a   :  { %v1783_v54 = vld [vmem:[#allocation8 + $0x154] sm:$0xf]  ;;  %v1785_v55 = vld [vmem:[#allocation8 + $0x158] sm:$0xf0]  ;;  %v1337_v61 = vor.u32 %v1534_v44, %v1334_v45  ;;  %v1550_v17 = vld [vmem:[#allocation8 + $0x264] sm:$0xf] }
  0x4b   :  { %961 = vmatpush.bf16.msrb.mxu0 %v1145_v25  ;;  %974 = vmatpush.bf16.msrb.mxu1 %v1209_v26  ;;  %v108_v25 = vld [vmem:[#allocation7] sm:$0x3f]  ;;  %v1532_v2 = vld [vmem:[#allocation8 + $0x1d4] sm:$0xf]  ;;  %v1265_v8 = vor.u32 %v1783_v54, %v1785_v55  ;;  %v1566_v23 = vld [vmem:[#allocation8 + $0x2e4] sm:$0xf] }
  0x4c   :  { %937 = vmatpush.bf16.msra.mxu2 %v1381_v29  ;;  %950 = vmatpush.bf16.msra.mxu3 %v1445_v30  ;;  %v110_v26 = vperm.slane %v108_v25, 0  ;;  %v111_v27 = vperm.slane %v108_v25, 1  ;;  %v112_v32 = vperm.slane %v108_v25, 2  ;;  %v113_v33 = vperm.slane %v108_v25, 3  ;;  %v1318_v34 = vld [vmem:[#allocation8 + $0x1c8] sm:$0xf0] }
  0x4d   :  { %v115_v43 = vperm.slane %v108_v25, 5  ;;  %v1246_v54 = vld [vmem:[#allocation8 + $0x138] sm:$0xf0] }
  0x4f   :  { %962 = vmatpush.bf16.msrb.mxu0 %v1137_v37  ;;  %975 = vmatpush.bf16.msrb.mxu1 %v1201_v38  ;;  %v1342_v37 = vld [vmem:[#allocation8 + $0x1f8] sm:$0xf0] }
  0x50   :  { %938 = vmatpush.bf16.msra.mxu2 %v1373_v41  ;;  %951 = vmatpush.bf16.msra.mxu3 %v1437_v42  ;;  %v1270_v41 = vld [vmem:[#allocation8 + $0x168] sm:$0xf0]  ;;  %v114_v42 = vperm.slane %v108_v25, 4  ;;  %v1345_v47 = vor.u32 %v1536_v36, %v1342_v37 }
  0x51   :  { %v1273_v60 = vor.u32 %v1518_v40, %v1270_v41  ;;  %v1548_v41 = vld [vmem:[#allocation8 + $0x254] sm:$0xf] }
  0x53   :  { %963 = vmatpush.bf16.msrb.mxu0 %v1129_v49  ;;  %976 = vmatpush.bf16.msrb.mxu1 %v1193_v50  ;;  %v1406_v49 = vld [vmem:[#allocation8 + $0x278] sm:$0xf0]  ;;  %v1568_v50 = vld [vmem:[#allocation8 + $0x2f4] sm:$0xf] }
  0x54   :  { %939 = vmatpush.bf16.msra.mxu2 %v1365_v51  ;;  %952 = vmatpush.bf16.msra.mxu3 %v1429_v52  ;;  %v1473_v7 = vor.u32 %v1568_v50, %v1470_v53  ;;  %v1512_v53 = vld [vmem:[#allocation8 + $0x134] sm:$0xf] }
  0x57   :  { %964 = vmatpush.bf16.msrb.mxu0 %v1121_v56  ;;  %977 = vmatpush.bf16.msrb.mxu1 %v1185_v58 }
  0x58   :  { %940 = vmatpush.bf16.msra.mxu2 %v1357_v62  ;;  %953 = vmatpush.bf16.msra.mxu3 %v1421_v0 }
  0x5b   :  { %965 = vmatpush.bf16.msrb.mxu0 %v1113_v3  ;;  %978 = vmatpush.bf16.msrb.mxu1 %v1177_v6  ;;  %v1326_v3 = vld [vmem:[#allocation8 + $0x1d8] sm:$0xf0]  ;;  %v1409_v6 = vor.u32 %v1552_v48, %v1406_v49 }
  0x5c   :  { %941 = vmatpush.bf16.msra.mxu2 %v1349_v9  ;;  %954 = vmatpush.bf16.msra.mxu3 %v1413_v12  ;;  %v1454_v48 = vld [vmem:[#allocation8 + $0x2d8] sm:$0xf0] }
  0x5f   :  { %966 = vmatpush.bf16.msrb.mxu0 %v1105_v16  ;;  %979 = vmatpush.bf16.msrb.mxu1 %v1169_v18  ;;  %v1329_v16 = vor.u32 %v1532_v2, %v1326_v3  ;;  %v1398_v18 = vld [vmem:[#allocation8 + $0x268] sm:$0xf0]  ;;  %v1562_v2 = vld [vmem:[#allocation8 + $0x2c4] sm:$0xf] }
  0x60   :  { %v1401_v36 = vor.u32 %v1550_v17, %v1398_v18  ;;  %v1446_v3 = vld [vmem:[#allocation8 + $0x2c8] sm:$0xf0]  ;;  %v1560_v18 = vld [vmem:[#allocation8 + $0x2b4] sm:$0xf] }
  0x63   :  { %967 = vmatpush.bf16.msrb.mxu0 %v1097_v22  ;;  %980 = vmatpush.bf16.msrb.mxu1 %v1161_v24  ;;  %v1462_v24 = vld [vmem:[#allocation8 + $0x2e8] sm:$0xf0] }
  0x9a   :  { %v143_v28 = vpop.f32.mrf.mxu0  ;;  %v163_v29 = vpop.f32.mrf.mxu1 }
  0x9b   :  { %v144_v30 = vadd.f32 %v143_v28, %v110_v26  ;;  %v164_v31 = vadd.f32 %v163_v29, %v111_v27  ;;  %v1514_v28 = vld [vmem:[#allocation8 + $0x144] sm:$0xf]  ;;  %v1254_v29 = vld [vmem:[#allocation8 + $0x148] sm:$0xf0] }
  0x9d   :  { %v246_v38 = vmax.f32 %v144_v30, 0.0  ;;  %v247_v39 = vmax.f32 %v164_v31, 0.0 }
  0x9f   :  { %v1779_v51 = vpack.c.bf16 %v246_v38, %v246_v38  ;;  %v1781_v52 = vpack.c.bf16 %v247_v39, %v247_v39  ;;  %v266_v56 = vmul.f32 %v246_v38, %v246_v38  ;;  %v267_v57 = vmul.f32 %v247_v39, %v247_v39 }
  0xa0   :  { %v253_v62 = vsel %vm252_vm1, %v246_v38, 0.0  ;;  %v254_v63 = vsel %vm252_vm1, %v247_v39, 0.0  ;;  %v1465_v38 = vor.u32 %v1566_v23, %v1462_v24  ;;  %v1257_v39 = vor.u32 %v1514_v28, %v1254_v29  ;;  %v1230_v23 = vld [vmem:[#allocation8 + $0x118] sm:$0xf0]  ;;  %v1524_v24 = vld [vmem:[#allocation8 + $0x194] sm:$0xf] }
  0xa1   :  { %v183_v58 = vpop.f32.mrf.mxu2  ;;  %v203_v59 = vpop.f32.mrf.mxu3  ;;  %890 = vmatmul.bf16.vlgmr.msrb.gmra.mxu2 %v1779_v51  ;;  %903 = vmatmul.bf16.vlgmr.msrb.gmra.mxu3 %v1781_v52  ;;  %v272_v13 = vsel %vm252_vm1, %v266_v56, 0.0  ;;  %v255_v14 = vadd.f32 %v254_v63, %v253_v62  ;;  %v273_v15 = vsel %vm252_vm1, %v267_v57, 0.0  ;;  %v1528_v56 = vld [vmem:[#allocation8 + $0x1b4] sm:$0xf]  ;;  %v1310_v57 = vld [vmem:[#allocation8 + $0x1b8] sm:$0xf0] }
  0xa2   :  { %v184_v0 = vadd.f32 %v183_v58, %v112_v32  ;;  %v204_v1 = vadd.f32 %v203_v59, %v113_v33  ;;  %986 = vmatpush.bf16.msrb.mxu2 %v1281_v46  ;;  %999 = vmatpush.bf16.msrb.mxu3 %v1345_v47  ;;  %v274_v31 = vadd.f32 %v273_v15, %v272_v13  ;;  %v1530_v33 = vld [vmem:[#allocation8 + $0x1c4] sm:$0xf]  ;;  %v1564_v47 = vld [vmem:[#allocation8 + $0x2d4] sm:$0xf]  ;;  %v1382_v62 = vld [vmem:[#allocation8 + $0x248] sm:$0xf0] }
  0xa3   :  { %v223_v4 = vpop.f32.mrf.mxu0  ;;  %v243_v5 = vpop.f32.mrf.mxu1  ;;  %v1321_v45 = vor.u32 %v1530_v33, %v1318_v34  ;;  %v1374_v15 = vld [vmem:[#allocation8 + $0x238] sm:$0xf0]  ;;  %v1558_v33 = vld [vmem:[#allocation8 + $0x2a4] sm:$0xf]  ;;  %v1430_v34 = vld [vmem:[#allocation8 + $0x2a8] sm:$0xf0] }
  0xa4   :  { %v248_v9 = vmax.f32 %v184_v0, 0.0  ;;  %v249_v10 = vmax.f32 %v204_v1, 0.0  ;;  %v224_v11 = vadd.f32 %v223_v4, %v114_v42  ;;  %v244_v12 = vadd.f32 %v243_v5, %v115_v43  ;;  %v1390_v42 = vld [vmem:[#allocation8 + $0x258] sm:$0xf0] }
  0xa5   :  { %v1393_v55 = vor.u32 %v1548_v41, %v1390_v42  ;;  %v1249_v1 = vor.u32 %v1512_v53, %v1246_v54  ;;  %v1433_v41 = vor.u32 %v1558_v33, %v1430_v34  ;;  %v1540_v42 = vld [vmem:[#allocation8 + $0x214] sm:$0xf]  ;;  %v1414_v53 = vld [vmem:[#allocation8 + $0x288] sm:$0xf0] }
  0xa6   :  { %v256_v19 = vsel %vm252_vm1, %v248_v9, 0.0  ;;  %v268_v20 = vmul.f32 %v248_v9, %v248_v9  ;;  %v1796_v21 = vpack.c.bf16 %v248_v9, %v248_v9  ;;  %v269_v22 = vmul.f32 %v249_v10, %v249_v10  ;;  %987 = vmatpush.bf16.msrb.mxu2 %v1273_v60  ;;  %1000 = vmatpush.bf16.msrb.mxu3 %v1337_v61  ;;  %v1546_v61 = vld [vmem:[#allocation8 + $0x244] sm:$0xf] }
  0xa7   :  { %v1798_v25 = vpack.c.bf16 %v249_v10, %v249_v10  ;;  %v250_v26 = vmax.f32 %v224_v11, 0.0  ;;  %v251_v27 = vmax.f32 %v244_v12, 0.0  ;;  %v257_v30 = vadd.f32 %v256_v19, %v255_v14  ;;  %v1302_v11 = vld [vmem:[#allocation8 + $0x1a8] sm:$0xf0]  ;;  %v1544_v14 = vld [vmem:[#allocation8 + $0x234] sm:$0xf] }
  0xa8   :  { %v275_v32 = vsel %vm252_vm1, %v268_v20, 0.0  ;;  %916 = vmatmul.bf16.vlgmr.msra.gmra.mxu0 %v1796_v21  ;;  %v258_v35 = vsel %vm252_vm1, %v249_v10, 0.0  ;;  %v277_v49 = vsel %vm252_vm1, %v269_v22, 0.0  ;;  %v1457_v60 = vor.u32 %v1564_v47, %v1454_v48  ;;  %v1526_v10 = vld [vmem:[#allocation8 + $0x1a4] sm:$0xf] }
  0xa9   :  { %929 = vmatmul.bf16.vlgmr.msra.gmra.mxu1 %v1798_v25  ;;  %1012 = vmatpush.bf16.msra.mxu0 %v1409_v6  ;;  %v260_v37 = vsel %vm252_vm1, %v250_v26, 0.0  ;;  %v259_v40 = vadd.f32 %v258_v35, %v257_v30  ;;  %v276_v43 = vadd.f32 %v275_v32, %v274_v31  ;;  %v270_v44 = vmul.f32 %v250_v26, %v250_v26  ;;  %v1438_v19 = vld [vmem:[#allocation8 + $0x2b8] sm:$0xf0]  ;;  %v1508_v22 = vld [vmem:[#allocation8 + $0x114] sm:$0xf] }
  0xaa   :  { %1025 = vmatpush.bf16.msra.mxu1 %v1473_v7  ;;  %988 = vmatpush.bf16.msrb.mxu2 %v1265_v8  ;;  %v262_v46 = vsel %vm252_vm1, %v251_v27, 0.0  ;;  %v1807_v58 = vpack.c.bf16 %v250_v26, %v250_v26  ;;  %v1809_v0 = vpack.c.bf16 %v251_v27, %v251_v27  ;;  %v271_v4 = vmul.f32 %v251_v27, %v251_v27  ;;  %v1510_v7 = vld [vmem:[#allocation8 + $0x124] sm:$0xf]  ;;  %v1238_v8 = vld [vmem:[#allocation8 + $0x128] sm:$0xf0] }
  0xab   :  { %1001 = vmatpush.bf16.msrb.mxu3 %v1329_v16  ;;  %v261_v50 = vadd.f32 %v260_v37, %v259_v40  ;;  %v278_v63 = vadd.f32 %v277_v49, %v276_v43  ;;  %v279_v5 = vsel %vm252_vm1, %v270_v44, 0.0  ;;  %v1313_v6 = vor.u32 %v1528_v56, %v1310_v57  ;;  %v1294_v26 = vld [vmem:[#allocation8 + $0x198] sm:$0xf0]  ;;  %v1542_v30 = vld [vmem:[#allocation8 + $0x224] sm:$0xf] }
  0xac   :  { %v1385_v9 = vor.u32 %v1546_v61, %v1382_v62  ;;  %v1449_v12 = vor.u32 %v1562_v2, %v1446_v3  ;;  %v1241_v16 = vor.u32 %v1510_v7, %v1238_v8  ;;  %v281_v17 = vsel %vm252_vm1, %v271_v4, 0.0  ;;  %v1366_v32 = vld [vmem:[#allocation8 + $0x228] sm:$0xf0]  ;;  %v1358_v44 = vld [vmem:[#allocation8 + $0x218] sm:$0xf0] }
  0xad   :  { %1013 = vmatpush.bf16.msra.mxu0 %v1401_v36  ;;  %v263_v59 = vadd.f32 %v262_v46, %v261_v50  ;;  %v280_v13 = vadd.f32 %v279_v5, %v278_v63  ;;  %v1305_v20 = vor.u32 %v1526_v10, %v1302_v11  ;;  %v1377_v28 = vor.u32 %v1544_v14, %v1374_v15  ;;  %v1506_v36 = vld [vmem:[#allocation8 + $0x104] sm:$0xf]  ;;  %v1222_v37 = vld [vmem:[#allocation8 + $0x108] sm:$0xf0]  ;;  %v1422_v46 = vld [vmem:[#allocation8 + $0x298] sm:$0xf0] }
  0xae   :  { %1026 = vmatpush.bf16.msra.mxu1 %v1465_v38  ;;  %989 = vmatpush.bf16.msrb.mxu2 %v1257_v39  ;;  %v1441_v29 = vor.u32 %v1560_v18, %v1438_v19  ;;  %v1233_v31 = vor.u32 %v1508_v22, %v1230_v23  ;;  %v1297_v35 = vor.u32 %v1524_v24, %v1294_v26  ;;  %v1522_v38 = vld [vmem:[#allocation8 + $0x184] sm:$0xf]  ;;  %v1286_v39 = vld [vmem:[#allocation8 + $0x188] sm:$0xf0]  ;;  %v1041_v24 = vld [vmem:[%s1835_s4] sm:$0x3] }
  0xaf   :  { %1002 = vmatpush.bf16.msrb.mxu3 %v1321_v45  ;;  %264 = vadd.xlane.f32.xlu0 %v263_v59  ;;  %v282_v27 = vadd.f32 %v281_v17, %v280_v13  ;;  %v1369_v40 = vor.u32 %v1542_v30, %v1366_v32  ;;  %v1225_v43 = vor.u32 %v1506_v36, %v1222_v37  ;;  %v1556_v45 = vld [vmem:[#allocation8 + $0x294] sm:$0xf]  ;;  %v1538_v49 = vld [vmem:[#allocation8 + $0x204] sm:$0xf]  ;;  %v1043_v34 = vperm.slane %v1041_v24, 0  ;;  %s1717_s4 = smov [#allocation10]  }
  0xb0   :  { %v1289_v47 = vor.u32 %v1522_v38, %v1286_v39  ;;  %v1361_v48 = vor.u32 %v1540_v42, %v1358_v44  ;;  %v1554_v50 = vld [vmem:[#allocation8 + $0x284] sm:$0xf]  ;;  %v1044_v37 = vperm.slane %v1041_v24, 1  ;;  %s1070_s21 = sshll.u32 %s1717_s4, 4  ;;  %s1071_s21 = int_to_ptr.vmem [resolvable:$true] %s1070_s21 }
  0xb1   :  { %1014 = vmatpush.bf16.msra.mxu0 %v1393_v55  ;;  %942 = vmatmul.bf16.vlgmr.msra.gmra.mxu2 %v1807_v58  ;;  %v1417_v55 = vor.u32 %v1554_v50, %v1414_v53 }
  0xb2   :  { %1027 = vmatpush.bf16.msra.mxu1 %v1457_v60  ;;  %955 = vmatmul.bf16.vlgmr.msra.gmra.mxu3 %v1809_v0 }
  0xb3   :  { %990 = vmatpush.bf16.msrb.mxu2 %v1249_v1  ;;  %1003 = vmatpush.bf16.msrb.mxu3 %v1313_v6 }
  0xb5   :  { %1015 = vmatpush.bf16.msra.mxu0 %v1385_v9 }
  0xb6   :  { %1028 = vmatpush.bf16.msra.mxu1 %v1449_v12 }
  0xb7   :  { %991 = vmatpush.bf16.msrb.mxu2 %v1241_v16  ;;  %1004 = vmatpush.bf16.msrb.mxu3 %v1305_v20 }
  0xb8   :  { %283 = vadd.xlane.f32.xlu0 %v282_v27  ;;  %968 = vmatmul.bf16.vlgmr.msrb.gmra.mxu0 %v1779_v51  ;;  %v1425_v51 = vor.u32 %v1556_v45, %v1422_v46 }
  0xb9   :  { %981 = vmatmul.bf16.vlgmr.msrb.gmra.mxu1 %v1781_v52  ;;  %1016 = vmatpush.bf16.msra.mxu0 %v1377_v28  ;;  %v1350_v52 = vld [vmem:[#allocation8 + $0x208] sm:$0xf0] }
  0xba   :  { %1029 = vmatpush.bf16.msra.mxu1 %v1441_v29  ;;  %v1353_v54 = vor.u32 %v1538_v49, %v1350_v52 }
  0xbb   :  { %992 = vmatpush.bf16.msrb.mxu2 %v1233_v31  ;;  %1005 = vmatpush.bf16.msrb.mxu3 %v1297_v35 }
  0xbd   :  { %1017 = vmatpush.bf16.msra.mxu0 %v1369_v40 }
  0xbe   :  { %1030 = vmatpush.bf16.msra.mxu1 %v1433_v41  ;;  %v1051_v41 = vld [vmem:[%s1836_s5] sm:$0x3] }
  0xbf   :  { %993 = vmatpush.bf16.msrb.mxu2 %v1225_v43  ;;  %1006 = vmatpush.bf16.msrb.mxu3 %v1289_v47  ;;  %v1054_v47 = vperm.slane %v1051_v41, 1  ;;  %v1053_v52 = vperm.slane %v1051_v41, 0 }
  0xc1   :  { %1018 = vmatpush.bf16.msra.mxu0 %v1361_v48 }
  0xc2   :  { %1031 = vmatpush.bf16.msra.mxu1 %v1425_v51  ;;  %994 = vmatmul.bf16.vlgmr.msrb.gmra.mxu2 %v1796_v21 }
  0xc3   :  { %1007 = vmatmul.bf16.vlgmr.msrb.gmra.mxu3 %v1798_v25 }
  0xc5   :  { %1019 = vmatpush.bf16.msra.mxu0 %v1353_v54 }
  0xc6   :  { %1032 = vmatpush.bf16.msra.mxu1 %v1417_v55 }
  0xc8   :  { %1020 = vmatmul.bf16.vlgmr.msra.gmra.mxu0 %v1807_v58 }
  0xc9   :  { %1033 = vmatmul.bf16.vlgmr.msra.gmra.mxu1 %v1809_v0 }
 0x122   :  { %v265_v56 = vpop.xlane.xlu0 %264 }
 0x123   :  { %v285_v62 = vmul.f32 0.0013020834, %v265_v56 }
 0x124   :  { %v891_v57 = vpop.f32.mrf.mxu2  ;;  %v904_v59 = vpop.f32.mrf.mxu3 }
 0x125   :  { %v917_v60 = vpop.f32.mrf.mxu0  ;;  %v287_v1 = vmul.f32 %v285_v62, %v285_v62  ;;  %v905_v16 = vadd.f32 %v904_v59, %v891_v57 }
 0x126   :  { %v930_v61 = vpop.f32.mrf.mxu1 }
 0x127   :  { %v918_v20 = vadd.f32 %v917_v60, %v905_v16 }
 0x129   :  { %v931_v28 = vadd.f32 %v930_v61, %v918_v20 }
 0x12b   :  { %v284_v63 = vpop.xlane.xlu0 %283 }
 0x12c   :  { %v286_v2 = vmul.f32 0.0013020834, %v284_v63  ;;  %v893_v3 = vpop.f32.mrf.mxu2  ;;  %v906_v4 = vpop.f32.mrf.mxu3 }
 0x12d   :  { %v919_v5 = vpop.f32.mrf.mxu0 }
 0x12e   :  { %v288_v21 = vsub.f32 %v286_v2, %v287_v1  ;;  %v932_v25 = vpop.f32.mrf.mxu1 }
 0x130   :  { %v289_v6 = vadd.f32 1e-05, %v288_v21 }
 0x132   :  { %1579 = vrsqrt.f32 %v289_v6  ;;  %vm296_vm3 = vweird.f32 %v289_v6 }
 0x134   :  { %v943_v7 = vpop.f32.mrf.mxu2 }
 0x135   :  { %v956_v58 = vpop.f32.mrf.mxu3  ;;  %v969_v8 = vpop.f32.mrf.mxu0  ;;  %v944_v32 = vadd.f32 %v943_v7, %v931_v28 }
 0x136   :  { %v982_v0 = vpop.f32.mrf.mxu1 }
 0x137   :  { %v983_v22 = vadd.f32 %v982_v0, %v969_v8  ;;  %v957_v38 = vadd.f32 %v956_v58, %v944_v32 }
 0x138   :  { %v1580_v9 = vpop.eup %1579 }
 0x139   :  { %v291_v10 = vmul.f32 %v1580_v9, %v289_v6  ;;  %vm297_vm2 = vweird.f32 %v1580_v9 }
 0x13a   :  { %vm298_vm4 = vmor %vm296_vm3, %vm297_vm2 }
 0x13b   :  { %v292_v11 = vmul.f32 %v1580_v9, %v291_v10 }
 0x13c   :  { %v945_v13 = vpop.f32.mrf.mxu2 }
 0x13d   :  { %v293_v12 = vmul.f32 0.5, %v292_v11  ;;  %v958_v14 = vpop.f32.mrf.mxu3  ;;  %v971_v15 = vpop.f32.mrf.mxu0 }
 0x13e   :  { %v984_v18 = vpop.f32.mrf.mxu1 }
 0x13f   :  { %v294_v17 = vsub.f32 1.5, %v293_v12 }
 0x141   :  { %v295_v19 = vmul.f32 %v1580_v9, %v294_v17 }
 0x143   :  { %v299_v23 = vsel %vm298_vm4, %v1580_v9, %v295_v19 }
 0x144   :  { %v1040_v33 = vmul.f32 %v299_v23, %v285_v62  ;;  %v1038_v44 = vmul.f32 %v957_v38, %v299_v23 }
 0x145   :  { %v995_v26 = vpop.f32.mrf.mxu2  ;;  %v1021_v30 = vpop.f32.mrf.mxu0 }
 0x146   :  { %v1008_v27 = vpop.f32.mrf.mxu3  ;;  %v996_v29 = vadd.f32 %v995_v26, %v983_v22  ;;  %v1034_v31 = vpop.f32.mrf.mxu1  ;;  %v1047_v39 = vmul.f32 %v1043_v34, %v1040_v33  ;;  %v1048_v46 = vmul.f32 %v1044_v37, %v1040_v33 }
 0x148   :  { %v1009_v35 = vadd.f32 %v1008_v27, %v996_v29  ;;  %v1049_v49 = vsub.f32 %v1038_v44, %v1047_v39 }
 0x14a   :  { %v1022_v36 = vadd.f32 %v1021_v30, %v1009_v35  ;;  %v1057_v54 = vadd.f32 %v1053_v52, %v1049_v49 }
 0x14c   :  { %v1035_v40 = vadd.f32 %v1034_v31, %v1022_v36 }
 0x14d   :  { %v997_v42 = vpop.f32.mrf.mxu2  ;;  %v1023_v48 = vpop.f32.mrf.mxu0 }
 0x14e   :  { %v1010_v43 = vpop.f32.mrf.mxu3  ;;  %v1039_v45 = vmul.f32 %v1035_v40, %v299_v23  ;;  %v1036_v51 = vpop.f32.mrf.mxu1 }
 0x150   :  { %v1050_v50 = vsub.f32 %v1039_v45, %v1048_v46 }
 0x152   :  { %v1058_v53 = vadd.f32 %v1054_v47, %v1050_v50 }
 0x154   :  { %v1061_v55 = vrot.slane %v1058_v53, 6 }
 0x156   :  { %v1062_v56 = vsel %vm252_vm1, %v1057_v54, %v1061_v55 }
 0x157   :  { %1064 = vst [vmem:[#allocation10] sm:$0xf] %v1062_v56 }
 0x158   :  { %1075 = dma.vmem_to_hbm [thread:$0]  %s1071_s21, 64, %s1073_s24, [#allocation4]  }
 0x159   :  { %1707 = dma.done.wait [#allocation4], 64  }
 0x15a   :  { %1708 = vsyncadd [#allocation4], 4294967232 }
 0x15b   :  { %1080 = vsyncpa [#allocation3], 1 }
 0x15c   :  { %1081 = vsyncpa [#allocation6], 1 }
 0x15d   :  { %1082 = vsyncpa [#allocation9], 1 }
 0x15e   :  { %1083 = vsyncpa [#allocation4], 1 }

</bundles_post_ra>
